<compile_context>
chip_gen: v5e
topology: v5e:2x2
jax: 0.10.0
libtpu: 0.0.40
codegen_flags: <defaults>
</compile_context>

<pallas_src>
import jax
import jax.numpy as jnp
from jax.experimental import pallas as pl
from jax.experimental.pallas import tpu as pltpu


# ---------------------------------------------------------------------------
# Fused kernel.
#
# Layouts:
#   x_ref   : (N, H, W*C)    f32   lane-dense NHWC slab (lane = x*C + c)
#   w*_ref  : (3, WpC, W*C)  bf16  per-dy row-Toeplitz conv matrices,
#                                  WpC = (W+2)*C padded-row width
#   g/b_ref : (1, C)         f32   BN affine params
#   alpha   : (1, 1)         f32   shared PReLU slope (SMEM)
#   s_ref   : (W*C, C)       f32   lane -> channel one-hot gather
#   st_ref  : (C, W*C)       f32   channel -> lane one-hot scatter
#   o_ref   : (N*H, W*C)     f32
# Scratch:
#   pad_ref : (N, H+2, WpC)  f32   zero-halo padded activation slab
# ---------------------------------------------------------------------------
def _block_kernel(x_ref, w1_ref, w2_ref, g1_ref, b1_ref, g2_ref, b2_ref,
                  alpha_ref, s_ref, st_ref, o_ref, pad_ref):
    N, H, L = x_ref.shape
    _, _, WpC = pad_ref.shape
    _, C = s_ref.shape
    M = N * H
    W = L // C
    n_elems = N * H * W                      # elements per channel for BN stats
    eps = 1e-5
    alpha = alpha_ref[0, 0]                  # scalar from SMEM

    def conv(wm_ref):
        # 3 accumulated per-dy MXU dots; LHS read straight from the padded
        # scratch (no materialized im2col), bf16 operands, f32 accumulation.
        acc = None
        for dy in range(3):
            lhs = pad_ref[:, dy:dy + H, :].reshape(M, WpC).astype(jnp.bfloat16)
            part = jnp.dot(lhs, wm_ref[dy],
                           preferred_element_type=jnp.float32)    # (M, L)
            acc = part if acc is None else acc + part
        return acc

    def bn_prelu(h, g_ref, b_ref, residual=None):
        # Single-pass training-mode batch stats; sum & sumsq fused in one dot.
        stats = jnp.concatenate(
            [jnp.sum(h, axis=0, keepdims=True),
             jnp.sum(h * h, axis=0, keepdims=True)], axis=0)      # (2, L)
        cs = jnp.dot(stats, s_ref[...],
                     preferred_element_type=jnp.float32)          # (2, C)
        mean = cs[0:1] / n_elems                                  # (1, C)
        var = jnp.maximum(cs[1:2] / n_elems - mean * mean, 0.0)   # biased var
        inv = jax.lax.rsqrt(var + eps)
        scale = g_ref[...] * inv                                  # fold affine
        shift = b_ref[...] - mean * scale
        ss = jnp.concatenate([scale, shift], axis=0)              # (2, C)
        ss_l = jnp.dot(ss, st_ref[...],
                       preferred_element_type=jnp.float32)        # (2, L)
        y = h * ss_l[0:1] + ss_l[1:2]
        if residual is not None:
            y = y + residual
        return jnp.where(y > 0, y, alpha * y)                     # PReLU

    # Halo-only zeroing (rows 0 and H+1, plus the two pad columns of interior
    # rows); the data lanes are fully overwritten below and the halo is shared
    # by both convs.
    pad_ref[:, 0:1, :] = jnp.zeros((N, 1, WpC), pad_ref.dtype)
    pad_ref[:, H + 1:H + 2, :] = jnp.zeros((N, 1, WpC), pad_ref.dtype)
    pad_ref[:, 1:H + 1, L:WpC] = jnp.zeros((N, H, WpC - L), pad_ref.dtype)

    # conv1 -> bn1 -> prelu
    pad_ref[:, 1:H + 1, 0:L] = x_ref[...]
    y1 = bn_prelu(conv(w1_ref), g1_ref, b1_ref)                   # (M, L)

    # conv2 -> bn2 -> +identity -> prelu (padded scratch reused, halo still 0)
    pad_ref[:, 1:H + 1, 0:L] = y1.reshape(N, H, L)
    o_ref[...] = bn_prelu(conv(w2_ref), g2_ref, b2_ref,
                          residual=x_ref[...].reshape(M, L))


# ---------------------------------------------------------------------------
# Wrapper-side weight preprocessing (tiny, runs in XLA once per trace).
# ---------------------------------------------------------------------------
def _conv_weight_matrix(w_oihw, W):
    """PyTorch OIHW 3x3 weight -> (3, (W+2)*Cin, W*Cout) per-dy Toeplitz blocks.

    Row index within a dy block = (padded column, cin) with padded columns
    ordered [1..W, 0, W+1] to match the kernel's pad_ref lane layout
    (data lanes first, then left pad, then right pad).
    Column index = x*Cout + co.
    """
    Cout, Cin, KH, KW = w_oihw.shape
    Wp = W + 2
    w = w_oihw.astype(jnp.float32)

    xp = jnp.arange(Wp)[:, None]            # padded input column
    xo = jnp.arange(W)[None, :]             # output column
    dx = xp - xo                            # tap offset
    valid = (dx >= 0) & (dx <= KW - 1)
    dx_c = jnp.clip(dx, 0, KW - 1)

    blocks = []
    for dy in range(KH):
        wt = jnp.transpose(w[:, :, dy, :], (2, 1, 0))      # (KW, Cin, Cout)
        blk = wt[dx_c]                                     # (Wp, W, Cin, Cout)
        blk = jnp.where(valid[:, :, None, None], blk, 0.0)
        blk = jnp.transpose(blk, (0, 2, 1, 3))             # (Wp, Cin, W, Cout)
        blocks.append(blk)
    mat = jnp.stack(blocks, axis=0)                        # (3, Wp, Cin, W, Cout)

    # Reorder padded columns to the kernel's lane layout: [1..W, 0, W+1].
    perm = jnp.array(list(range(1, W + 1)) + [0, W + 1], dtype=jnp.int32)
    mat = mat[:, perm]
    return mat.reshape(KH, Wp * Cin, W * Cout)


@jax.jit
def basic_block_prelu(x_nchw, w1, g1, b1, w2, g2, b2, alpha):
    """Forward pass of BasicBlock_prelu (stride=1, downsample=None)."""
    N, Cin, H, W = x_nchw.shape
    Cout = w1.shape[0]
    assert Cin == Cout, "identity path requires inplanes == planes"
    C = Cout
    L = W * C
    WpC = (W + 2) * C
    M = N * H

    # Layout plumbing: NCHW -> lane-dense (N, H, W*C) slab (tiny).
    x_flat = jnp.transpose(x_nchw, (0, 2, 3, 1)).reshape(N, H, L)
    x_flat = x_flat.astype(jnp.float32)

    # Conv weights as per-dy Toeplitz blocks, bf16 for native MXU throughput.
    wmat1 = _conv_weight_matrix(w1, W).astype(jnp.bfloat16)   # (3, WpC, L)
    wmat2 = _conv_weight_matrix(w2, W).astype(jnp.bfloat16)

    # Lane <-> channel one-hot matrices for per-channel BN statistics (f32).
    lanes = jnp.arange(L)
    chans = jnp.arange(C)
    s_mat = (lanes[:, None] % C == chans[None, :]).astype(jnp.float32)   # (L, C)
    st_mat = s_mat.T                                                     # (C, L)

    def full(shape):
        return pl.BlockSpec(shape, lambda *_: (0,) * len(shape))

    out_flat = pl.pallas_call(
        _block_kernel,
        out_shape=jax.ShapeDtypeStruct((M, L), jnp.float32),
        in_specs=[full((N, H, L)),
                  full((3, WpC, L)), full((3, WpC, L)),
                  full((1, C)), full((1, C)), full((1, C)), full((1, C)),
                  pl.BlockSpec(memory_space=pltpu.MemorySpace.SMEM),  # alpha
                  full((L, C)), full((C, L))],
        out_specs=full((M, L)),
        scratch_shapes=[pltpu.VMEM((N, H + 2, WpC), jnp.float32)],
    )(x_flat, wmat1, wmat2,
      g1.reshape(1, C).astype(jnp.float32), b1.reshape(1, C).astype(jnp.float32),
      g2.reshape(1, C).astype(jnp.float32), b2.reshape(1, C).astype(jnp.float32),
      jnp.reshape(alpha, (1, 1)).astype(jnp.float32), s_mat, st_mat)

    return jnp.transpose(out_flat.reshape(N, H, W, C), (0, 3, 1, 2))


# ---------------------------------------------------------------------------
# Pure-JAX reference (same training-mode BN semantics as the PyTorch module,
# full f32 conv -- the kernel uses bf16 MXU operands, hence the tolerance).
# ---------------------------------------------------------------------------
def _reference_block(x, w1, g1, b1, w2, g2, b2, alpha):
    def conv(h, w):
        return jax.lax.conv_general_dilated(
            h, w, window_strides=(1, 1), padding=((1, 1), (1, 1)),
            dimension_numbers=("NCHW", "OIHW", "NCHW"))

    def bn(h, g, b):
        mean = jnp.mean(h, axis=(0, 2, 3), keepdims=True)
        var = jnp.mean((h - mean) ** 2, axis=(0, 2, 3), keepdims=True)
        hn = (h - mean) * jax.lax.rsqrt(var + 1e-5)
        return hn * g.reshape(1, -1, 1, 1) + b.reshape(1, -1, 1, 1)

    def prelu(h):
        return jnp.where(h > 0, h, alpha * h)

    out = prelu(bn(conv(x, w1), g1, b1))
    out = bn(conv(out, w2), g2, b2) + x
    return prelu(out)


if __name__ == "__main__":
    key = jax.random.PRNGKey(0)
    N, C, H, W = 2, 4, 16, 16           # inplanes = planes = 4
    kx, kw1, kw2, kg1, kb1, kg2, kb2 = jax.random.split(key, 7)

    x = jax.random.normal(kx, (N, C, H, W), jnp.float32)
    w1 = 0.1 * jax.random.normal(kw1, (C, C, 3, 3), jnp.float32)
    w2 = 0.1 * jax.random.normal(kw2, (C, C, 3, 3), jnp.float32)
    g1 = 1.0 + 0.05 * jax.random.normal(kg1, (C,), jnp.float32)
    b1 = 0.05 * jax.random.normal(kb1, (C,), jnp.float32)
    g2 = 1.0 + 0.05 * jax.random.normal(kg2, (C,), jnp.float32)
    b2 = 0.05 * jax.random.normal(kb2, (C,), jnp.float32)
    alpha = jnp.asarray(0.25, jnp.float32)    # nn.PReLU() default init

    out = basic_block_prelu(x, w1, g1, b1, w2, g2, b2, alpha)
    jax.block_until_ready(out)
    assert out.shape == (N, C, H, W)

    ref = _reference_block(x, w1, g1, b1, w2, g2, b2, alpha)
    err = float(jnp.max(jnp.abs(out - ref)))
    # Tolerance loosened vs. the all-f32 version: conv operands are bf16 on the
    # MXU (f32 accumulation); structural bugs would show up as O(1) errors.
    assert err < 1e-1, f"mismatch vs reference: max abs err {err}"

    print("KERNEL_OK")
</pallas_src>

<mosaic_0001>
module attributes {stable_mosaic.version = 11 : i64} {
  func.func @_block_kernel(%arg0: memref<2x16x64xf32, #tpu.memory_space<vmem>>, %arg1: memref<3x72x64xbf16, #tpu.memory_space<vmem>>, %arg2: memref<3x72x64xbf16, #tpu.memory_space<vmem>>, %arg3: memref<1x4xf32, #tpu.memory_space<vmem>>, %arg4: memref<1x4xf32, #tpu.memory_space<vmem>>, %arg5: memref<1x4xf32, #tpu.memory_space<vmem>>, %arg6: memref<1x4xf32, #tpu.memory_space<vmem>>, %arg7: memref<1x1xf32, #tpu.memory_space<smem>>, %arg8: memref<64x4xf32, #tpu.memory_space<vmem>>, %arg9: memref<4x64xf32, #tpu.memory_space<vmem>>, %arg10: memref<32x64xf32, #tpu.memory_space<vmem>>, %arg11: memref<2x18x72xf32, #tpu.memory_space<vmem>>) attributes {dimension_semantics = [], scalar_prefetch = 0 : i64, scratch_operands = 1 : i64, tpu.core_type = #tpu.core_type<tc>} {
    %c0 = arith.constant 0 : index
    %c0_0 = arith.constant 0 : index
    %0 = memref.load %arg7[%c0, %c0_0] : memref<1x1xf32, #tpu.memory_space<smem>>
    %cst = arith.constant 0.000000e+00 : f32
    %1 = vector.broadcast %cst : f32 to vector<2x1x72xf32>
    %c0_1 = arith.constant 0 : index
    %c0_2 = arith.constant 0 : index
    %c0_3 = arith.constant 0 : index
    %2 = vector.load %arg11[%c0_1, %c0_2, %c0_3] : memref<2x18x72xf32, #tpu.memory_space<vmem>>, vector<2x1x72xf32>
    tpu.vector_store %arg11[%c0_1, %c0_2, %c0_3], %1 {strides = array<i32>} : memref<2x18x72xf32, #tpu.memory_space<vmem>>, vector<2x1x72xf32>,
    %cst_4 = arith.constant 0.000000e+00 : f32
    %3 = vector.broadcast %cst_4 : f32 to vector<2x1x72xf32>
    %c0_5 = arith.constant 0 : index
    %c17 = arith.constant 17 : index
    %c0_6 = arith.constant 0 : index
    %4 = vector.load %arg11[%c0_5, %c17, %c0_6] : memref<2x18x72xf32, #tpu.memory_space<vmem>>, vector<2x1x72xf32>
    tpu.vector_store %arg11[%c0_5, %c17, %c0_6], %3 {strides = array<i32>} : memref<2x18x72xf32, #tpu.memory_space<vmem>>, vector<2x1x72xf32>,
    %cst_7 = arith.constant 0.000000e+00 : f32
    %5 = vector.broadcast %cst_7 : f32 to vector<2x16x8xf32>
    %c0_8 = arith.constant 0 : index
    %c1 = arith.constant 1 : index
    %c64 = arith.constant 64 : index
    %6 = vector.load %arg11[%c0_8, %c1, %c64] : memref<2x18x72xf32, #tpu.memory_space<vmem>>, vector<2x16x8xf32>
    tpu.vector_store %arg11[%c0_8, %c1, %c64], %5 {strides = array<i32>} : memref<2x18x72xf32, #tpu.memory_space<vmem>>, vector<2x16x8xf32>,
    %c0_9 = arith.constant 0 : index
    %c0_10 = arith.constant 0 : index
    %c0_11 = arith.constant 0 : index
    %7 = vector.load %arg0[%c0_9, %c0_10, %c0_11] : memref<2x16x64xf32, #tpu.memory_space<vmem>>, vector<2x16x64xf32>
    %c0_12 = arith.constant 0 : index
    %c1_13 = arith.constant 1 : index
    %c0_14 = arith.constant 0 : index
    %8 = vector.load %arg11[%c0_12, %c1_13, %c0_14] : memref<2x18x72xf32, #tpu.memory_space<vmem>>, vector<2x16x64xf32>
    tpu.vector_store %arg11[%c0_12, %c1_13, %c0_14], %7 {strides = array<i32>} : memref<2x18x72xf32, #tpu.memory_space<vmem>>, vector<2x16x64xf32>,
    %c0_15 = arith.constant 0 : index
    %c0_16 = arith.constant 0 : index
    %c0_17 = arith.constant 0 : index
    %9 = vector.load %arg11[%c0_15, %c0_16, %c0_17] : memref<2x18x72xf32, #tpu.memory_space<vmem>>, vector<2x16x72xf32>
    %10 = vector.shape_cast %9 : vector<2x16x72xf32> to vector<32x72xf32>
    %11 = arith.truncf %10 : vector<32x72xf32> to vector<32x72xbf16>
    %c0_18 = arith.constant 0 : index
    %c0_19 = arith.constant 0 : index
    %c0_20 = arith.constant 0 : index
    %12 = vector.load %arg1[%c0_18, %c0_19, %c0_20] : memref<3x72x64xbf16, #tpu.memory_space<vmem>>, vector<1x72x64xbf16>
    %13 = vector.shape_cast %12 : vector<1x72x64xbf16> to vector<72x64xbf16>
    %cst_21 = arith.constant dense<0.000000e+00> : vector<32x64xf32>
    %14 = tpu.matmul %11, %13, %cst_21 {dimension_numbers = #tpu.dot_dimension_numbers<[1], [0], [0], [1], [0, 0, 1, 1], [], []>} : vector<32x72xbf16>, vector<72x64xbf16>, vector<32x64xf32> -> vector<32x64xf32>
    %c0_22 = arith.constant 0 : index
    %c1_23 = arith.constant 1 : index
    %c0_24 = arith.constant 0 : index
    %15 = vector.load %arg11[%c0_22, %c1_23, %c0_24] : memref<2x18x72xf32, #tpu.memory_space<vmem>>, vector<2x16x72xf32>
    %16 = vector.shape_cast %15 : vector<2x16x72xf32> to vector<32x72xf32>
    %17 = arith.truncf %16 : vector<32x72xf32> to vector<32x72xbf16>
    %c1_25 = arith.constant 1 : index
    %c0_26 = arith.constant 0 : index
    %c0_27 = arith.constant 0 : index
    %18 = vector.load %arg1[%c1_25, %c0_26, %c0_27] : memref<3x72x64xbf16, #tpu.memory_space<vmem>>, vector<1x72x64xbf16>
    %19 = vector.shape_cast %18 : vector<1x72x64xbf16> to vector<72x64xbf16>
    %cst_28 = arith.constant dense<0.000000e+00> : vector<32x64xf32>
    %20 = tpu.matmul %17, %19, %cst_28 {dimension_numbers = #tpu.dot_dimension_numbers<[1], [0], [0], [1], [0, 0, 1, 1], [], []>} : vector<32x72xbf16>, vector<72x64xbf16>, vector<32x64xf32> -> vector<32x64xf32>
    %21 = arith.addf %14, %20 : vector<32x64xf32>
    %c0_29 = arith.constant 0 : index
    %c2 = arith.constant 2 : index
    %c0_30 = arith.constant 0 : index
    %22 = vector.load %arg11[%c0_29, %c2, %c0_30] : memref<2x18x72xf32, #tpu.memory_space<vmem>>, vector<2x16x72xf32>
    %23 = vector.shape_cast %22 : vector<2x16x72xf32> to vector<32x72xf32>
    %24 = arith.truncf %23 : vector<32x72xf32> to vector<32x72xbf16>
    %c2_31 = arith.constant 2 : index
    %c0_32 = arith.constant 0 : index
    %c0_33 = arith.constant 0 : index
    %25 = vector.load %arg1[%c2_31, %c0_32, %c0_33] : memref<3x72x64xbf16, #tpu.memory_space<vmem>>, vector<1x72x64xbf16>
    %26 = vector.shape_cast %25 : vector<1x72x64xbf16> to vector<72x64xbf16>
    %cst_34 = arith.constant dense<0.000000e+00> : vector<32x64xf32>
    %27 = tpu.matmul %24, %26, %cst_34 {dimension_numbers = #tpu.dot_dimension_numbers<[1], [0], [0], [1], [0, 0, 1, 1], [], []>} : vector<32x72xbf16>, vector<72x64xbf16>, vector<32x64xf32> -> vector<32x64xf32>
    %28 = arith.addf %21, %27 : vector<32x64xf32>
    %cst_35 = arith.constant dense<0.000000e+00> : vector<64xf32>
    %29 = vector.multi_reduction <add>, %28, %cst_35 [0] : vector<32x64xf32> to vector<64xf32>
    %30 = vector.shape_cast %29 : vector<64xf32> to vector<1x64xf32>
    %31 = arith.mulf %28, %28 : vector<32x64xf32>
    %cst_36 = arith.constant dense<0.000000e+00> : vector<64xf32>
    %32 = vector.multi_reduction <add>, %31, %cst_36 [0] : vector<32x64xf32> to vector<64xf32>
    %33 = vector.shape_cast %32 : vector<64xf32> to vector<1x64xf32>
    %34 = tpu.concatenate %30, %33 in 0 : vector<1x64xf32>, vector<1x64xf32> -> vector<2x64xf32>
    %c0_37 = arith.constant 0 : index
    %c0_38 = arith.constant 0 : index
    %35 = vector.load %arg8[%c0_37, %c0_38] : memref<64x4xf32, #tpu.memory_space<vmem>>, vector<64x4xf32>
    %cst_39 = arith.constant dense<0.000000e+00> : vector<2x4xf32>
    %36 = tpu.matmul %34, %35, %cst_39 {dimension_numbers = #tpu.dot_dimension_numbers<[1], [0], [0], [1], [0, 0, 1, 1], [], []>} : vector<2x64xf32>, vector<64x4xf32>, vector<2x4xf32> -> vector<2x4xf32>
    %37 = vector.extract_strided_slice %36 {offsets = [0, 0], sizes = [1, 4], strides = [1, 1]} : vector<2x4xf32> to vector<1x4xf32>
    %cst_40 = arith.constant 5.120000e+02 : f32
    %38 = vector.broadcast %cst_40 : f32 to vector<1x4xf32>
    %39 = arith.divf %37, %38 : vector<1x4xf32>
    %40 = vector.extract_strided_slice %36 {offsets = [1, 0], sizes = [1, 4], strides = [1, 1]} : vector<2x4xf32> to vector<1x4xf32>
    %cst_41 = arith.constant 5.120000e+02 : f32
    %41 = vector.broadcast %cst_41 : f32 to vector<1x4xf32>
    %42 = arith.divf %40, %41 : vector<1x4xf32>
    %43 = arith.mulf %39, %39 : vector<1x4xf32>
    %44 = arith.subf %42, %43 : vector<1x4xf32>
    %cst_42 = arith.constant 0.000000e+00 : f32
    %45 = vector.broadcast %cst_42 : f32 to vector<1x4xf32>
    %46 = arith.maximumf %44, %45 : vector<1x4xf32>
    %cst_43 = arith.constant 9.99999974E-6 : f32
    %47 = vector.broadcast %cst_43 : f32 to vector<1x4xf32>
    %48 = arith.addf %46, %47 : vector<1x4xf32>
    %49 = math.rsqrt %48 : vector<1x4xf32>
    %c0_44 = arith.constant 0 : index
    %c0_45 = arith.constant 0 : index
    %50 = vector.load %arg3[%c0_44, %c0_45] : memref<1x4xf32, #tpu.memory_space<vmem>>, vector<1x4xf32>
    %51 = arith.mulf %50, %49 : vector<1x4xf32>
    %c0_46 = arith.constant 0 : index
    %c0_47 = arith.constant 0 : index
    %52 = vector.load %arg4[%c0_46, %c0_47] : memref<1x4xf32, #tpu.memory_space<vmem>>, vector<1x4xf32>
    %53 = arith.mulf %39, %51 : vector<1x4xf32>
    %54 = arith.subf %52, %53 : vector<1x4xf32>
    %55 = tpu.concatenate %51, %54 in 0 : vector<1x4xf32>, vector<1x4xf32> -> vector<2x4xf32>
    %c0_48 = arith.constant 0 : index
    %c0_49 = arith.constant 0 : index
    %56 = vector.load %arg9[%c0_48, %c0_49] : memref<4x64xf32, #tpu.memory_space<vmem>>, vector<4x64xf32>
    %cst_50 = arith.constant dense<0.000000e+00> : vector<2x64xf32>
    %57 = tpu.matmul %55, %56, %cst_50 {dimension_numbers = #tpu.dot_dimension_numbers<[1], [0], [0], [1], [0, 0, 1, 1], [], []>} : vector<2x4xf32>, vector<4x64xf32>, vector<2x64xf32> -> vector<2x64xf32>
    %58 = vector.extract_strided_slice %57 {offsets = [0, 0], sizes = [1, 64], strides = [1, 1]} : vector<2x64xf32> to vector<1x64xf32>
    %59 = vector.broadcast %58 : vector<1x64xf32> to vector<32x64xf32>
    %60 = arith.mulf %28, %59 : vector<32x64xf32>
    %61 = vector.extract_strided_slice %57 {offsets = [1, 0], sizes = [1, 64], strides = [1, 1]} : vector<2x64xf32> to vector<1x64xf32>
    %62 = vector.broadcast %61 : vector<1x64xf32> to vector<32x64xf32>
    %63 = arith.addf %60, %62 : vector<32x64xf32>
    %cst_51 = arith.constant 0.000000e+00 : f32
    %64 = vector.broadcast %cst_51 : f32 to vector<32x64xf32>
    %65 = arith.cmpf ogt, %63, %64 : vector<32x64xf32>
    %66 = vector.broadcast %0 : f32 to vector<32x64xf32>
    %67 = arith.mulf %66, %63 : vector<32x64xf32>
    %68 = arith.select %65, %63, %67 : vector<32x64xi1>, vector<32x64xf32>
    %69 = vector.shape_cast %68 : vector<32x64xf32> to vector<2x16x64xf32>
    %c0_52 = arith.constant 0 : index
    %c1_53 = arith.constant 1 : index
    %c0_54 = arith.constant 0 : index
    %70 = vector.load %arg11[%c0_52, %c1_53, %c0_54] : memref<2x18x72xf32, #tpu.memory_space<vmem>>, vector<2x16x64xf32>
    tpu.vector_store %arg11[%c0_52, %c1_53, %c0_54], %69 {strides = array<i32>} : memref<2x18x72xf32, #tpu.memory_space<vmem>>, vector<2x16x64xf32>,
    %c0_55 = arith.constant 0 : index
    %c0_56 = arith.constant 0 : index
    %c0_57 = arith.constant 0 : index
    %71 = vector.load %arg11[%c0_55, %c0_56, %c0_57] : memref<2x18x72xf32, #tpu.memory_space<vmem>>, vector<2x16x72xf32>
    %72 = vector.shape_cast %71 : vector<2x16x72xf32> to vector<32x72xf32>
    %73 = arith.truncf %72 : vector<32x72xf32> to vector<32x72xbf16>
    %c0_58 = arith.constant 0 : index
    %c0_59 = arith.constant 0 : index
    %c0_60 = arith.constant 0 : index
    %74 = vector.load %arg2[%c0_58, %c0_59, %c0_60] : memref<3x72x64xbf16, #tpu.memory_space<vmem>>, vector<1x72x64xbf16>
    %75 = vector.shape_cast %74 : vector<1x72x64xbf16> to vector<72x64xbf16>
    %cst_61 = arith.constant dense<0.000000e+00> : vector<32x64xf32>
    %76 = tpu.matmul %73, %75, %cst_61 {dimension_numbers = #tpu.dot_dimension_numbers<[1], [0], [0], [1], [0, 0, 1, 1], [], []>} : vector<32x72xbf16>, vector<72x64xbf16>, vector<32x64xf32> -> vector<32x64xf32>
    %c0_62 = arith.constant 0 : index
    %c1_63 = arith.constant 1 : index
    %c0_64 = arith.constant 0 : index
    %77 = vector.load %arg11[%c0_62, %c1_63, %c0_64] : memref<2x18x72xf32, #tpu.memory_space<vmem>>, vector<2x16x72xf32>
    %78 = vector.shape_cast %77 : vector<2x16x72xf32> to vector<32x72xf32>
    %79 = arith.truncf %78 : vector<32x72xf32> to vector<32x72xbf16>
    %c1_65 = arith.constant 1 : index
    %c0_66 = arith.constant 0 : index
    %c0_67 = arith.constant 0 : index
    %80 = vector.load %arg2[%c1_65, %c0_66, %c0_67] : memref<3x72x64xbf16, #tpu.memory_space<vmem>>, vector<1x72x64xbf16>
    %81 = vector.shape_cast %80 : vector<1x72x64xbf16> to vector<72x64xbf16>
    %cst_68 = arith.constant dense<0.000000e+00> : vector<32x64xf32>
    %82 = tpu.matmul %79, %81, %cst_68 {dimension_numbers = #tpu.dot_dimension_numbers<[1], [0], [0], [1], [0, 0, 1, 1], [], []>} : vector<32x72xbf16>, vector<72x64xbf16>, vector<32x64xf32> -> vector<32x64xf32>
    %83 = arith.addf %76, %82 : vector<32x64xf32>
    %c0_69 = arith.constant 0 : index
    %c2_70 = arith.constant 2 : index
    %c0_71 = arith.constant 0 : index
    %84 = vector.load %arg11[%c0_69, %c2_70, %c0_71] : memref<2x18x72xf32, #tpu.memory_space<vmem>>, vector<2x16x72xf32>
    %85 = vector.shape_cast %84 : vector<2x16x72xf32> to vector<32x72xf32>
    %86 = arith.truncf %85 : vector<32x72xf32> to vector<32x72xbf16>
    %c2_72 = arith.constant 2 : index
    %c0_73 = arith.constant 0 : index
    %c0_74 = arith.constant 0 : index
    %87 = vector.load %arg2[%c2_72, %c0_73, %c0_74] : memref<3x72x64xbf16, #tpu.memory_space<vmem>>, vector<1x72x64xbf16>
    %88 = vector.shape_cast %87 : vector<1x72x64xbf16> to vector<72x64xbf16>
    %cst_75 = arith.constant dense<0.000000e+00> : vector<32x64xf32>
    %89 = tpu.matmul %86, %88, %cst_75 {dimension_numbers = #tpu.dot_dimension_numbers<[1], [0], [0], [1], [0, 0, 1, 1], [], []>} : vector<32x72xbf16>, vector<72x64xbf16>, vector<32x64xf32> -> vector<32x64xf32>
    %90 = arith.addf %83, %89 : vector<32x64xf32>
    %c0_76 = arith.constant 0 : index
    %c0_77 = arith.constant 0 : index
    %c0_78 = arith.constant 0 : index
    %91 = vector.load %arg0[%c0_76, %c0_77, %c0_78] : memref<2x16x64xf32, #tpu.memory_space<vmem>>, vector<2x16x64xf32>
    %92 = vector.shape_cast %91 : vector<2x16x64xf32> to vector<32x64xf32>
    %cst_79 = arith.constant dense<0.000000e+00> : vector<64xf32>
    %93 = vector.multi_reduction <add>, %90, %cst_79 [0] : vector<32x64xf32> to vector<64xf32>
    %94 = vector.shape_cast %93 : vector<64xf32> to vector<1x64xf32>
    %95 = arith.mulf %90, %90 : vector<32x64xf32>
    %cst_80 = arith.constant dense<0.000000e+00> : vector<64xf32>
    %96 = vector.multi_reduction <add>, %95, %cst_80 [0] : vector<32x64xf32> to vector<64xf32>
    %97 = vector.shape_cast %96 : vector<64xf32> to vector<1x64xf32>
    %98 = tpu.concatenate %94, %97 in 0 : vector<1x64xf32>, vector<1x64xf32> -> vector<2x64xf32>
    %c0_81 = arith.constant 0 : index
    %c0_82 = arith.constant 0 : index
    %99 = vector.load %arg8[%c0_81, %c0_82] : memref<64x4xf32, #tpu.memory_space<vmem>>, vector<64x4xf32>
    %cst_83 = arith.constant dense<0.000000e+00> : vector<2x4xf32>
    %100 = tpu.matmul %98, %99, %cst_83 {dimension_numbers = #tpu.dot_dimension_numbers<[1], [0], [0], [1], [0, 0, 1, 1], [], []>} : vector<2x64xf32>, vector<64x4xf32>, vector<2x4xf32> -> vector<2x4xf32>
    %101 = vector.extract_strided_slice %100 {offsets = [0, 0], sizes = [1, 4], strides = [1, 1]} : vector<2x4xf32> to vector<1x4xf32>
    %cst_84 = arith.constant 5.120000e+02 : f32
    %102 = vector.broadcast %cst_84 : f32 to vector<1x4xf32>
    %103 = arith.divf %101, %102 : vector<1x4xf32>
    %104 = vector.extract_strided_slice %100 {offsets = [1, 0], sizes = [1, 4], strides = [1, 1]} : vector<2x4xf32> to vector<1x4xf32>
    %cst_85 = arith.constant 5.120000e+02 : f32
    %105 = vector.broadcast %cst_85 : f32 to vector<1x4xf32>
    %106 = arith.divf %104, %105 : vector<1x4xf32>
    %107 = arith.mulf %103, %103 : vector<1x4xf32>
    %108 = arith.subf %106, %107 : vector<1x4xf32>
    %cst_86 = arith.constant 0.000000e+00 : f32
    %109 = vector.broadcast %cst_86 : f32 to vector<1x4xf32>
    %110 = arith.maximumf %108, %109 : vector<1x4xf32>
    %cst_87 = arith.constant 9.99999974E-6 : f32
    %111 = vector.broadcast %cst_87 : f32 to vector<1x4xf32>
    %112 = arith.addf %110, %111 : vector<1x4xf32>
    %113 = math.rsqrt %112 : vector<1x4xf32>
    %c0_88 = arith.constant 0 : index
    %c0_89 = arith.constant 0 : index
    %114 = vector.load %arg5[%c0_88, %c0_89] : memref<1x4xf32, #tpu.memory_space<vmem>>, vector<1x4xf32>
    %115 = arith.mulf %114, %113 : vector<1x4xf32>
    %c0_90 = arith.constant 0 : index
    %c0_91 = arith.constant 0 : index
    %116 = vector.load %arg6[%c0_90, %c0_91] : memref<1x4xf32, #tpu.memory_space<vmem>>, vector<1x4xf32>
    %117 = arith.mulf %103, %115 : vector<1x4xf32>
    %118 = arith.subf %116, %117 : vector<1x4xf32>
    %119 = tpu.concatenate %115, %118 in 0 : vector<1x4xf32>, vector<1x4xf32> -> vector<2x4xf32>
    %c0_92 = arith.constant 0 : index
    %c0_93 = arith.constant 0 : index
    %120 = vector.load %arg9[%c0_92, %c0_93] : memref<4x64xf32, #tpu.memory_space<vmem>>, vector<4x64xf32>
    %cst_94 = arith.constant dense<0.000000e+00> : vector<2x64xf32>
    %121 = tpu.matmul %119, %120, %cst_94 {dimension_numbers = #tpu.dot_dimension_numbers<[1], [0], [0], [1], [0, 0, 1, 1], [], []>} : vector<2x4xf32>, vector<4x64xf32>, vector<2x64xf32> -> vector<2x64xf32>
    %122 = vector.extract_strided_slice %121 {offsets = [0, 0], sizes = [1, 64], strides = [1, 1]} : vector<2x64xf32> to vector<1x64xf32>
    %123 = vector.broadcast %122 : vector<1x64xf32> to vector<32x64xf32>
    %124 = arith.mulf %90, %123 : vector<32x64xf32>
    %125 = vector.extract_strided_slice %121 {offsets = [1, 0], sizes = [1, 64], strides = [1, 1]} : vector<2x64xf32> to vector<1x64xf32>
    %126 = vector.broadcast %125 : vector<1x64xf32> to vector<32x64xf32>
    %127 = arith.addf %124, %126 : vector<32x64xf32>
    %128 = arith.addf %127, %92 : vector<32x64xf32>
    %cst_95 = arith.constant 0.000000e+00 : f32
    %129 = vector.broadcast %cst_95 : f32 to vector<32x64xf32>
    %130 = arith.cmpf ogt, %128, %129 : vector<32x64xf32>
    %131 = vector.broadcast %0 : f32 to vector<32x64xf32>
    %132 = arith.mulf %131, %128 : vector<32x64xf32>
    %133 = arith.select %130, %128, %132 : vector<32x64xi1>, vector<32x64xf32>
    %c0_96 = arith.constant 0 : index
    %c0_97 = arith.constant 0 : index
    %134 = vector.load %arg10[%c0_96, %c0_97] : memref<32x64xf32, #tpu.memory_space<vmem>>, vector<32x64xf32>
    tpu.vector_store %arg10[%c0_96, %c0_97], %133 {strides = array<i32>} : memref<32x64xf32, #tpu.memory_space<vmem>>, vector<32x64xf32>,
    return
  }
}

</mosaic_0001>

<bundles_post_ra>
// kernel: basic_block_prelu.1
= control target key start
LH: loop header
LB: loop body
LE: loop exit
PB: predicated region body
PF: predicated region fallthrough
CT: control target
= control target key end

     0   :  { %vm43_vm0 = vcmask 589312   ;;  %v989_v6 = vmov 0.0   ;;  %vm122_vm1 = vcmask 1043456   ;;  %vm52_vm2 = vcmask 523264   ;;  %s1341_s1 = inlined_call_operand.vmem [shape: bf16[3,72,64], index: 1, kind: input, shape index: {}]   ;;  %s1342_s0 = inlined_call_operand.vmem [shape: f32[2,16,64], index: 0, kind: input, shape index: {}]   ;;  %s1343_s8 = inlined_call_operand.vmem [shape: f32[64,4], index: 8, kind: input, shape index: {}]   ;;  %s1344_s9 = inlined_call_operand.vmem [shape: f32[4,64], index: 9, kind: input, shape index: {}]   ;;  %s1345_s2 = inlined_call_operand.vmem [shape: bf16[3,72,64], index: 2, kind: input, shape index: {}]   ;;  %s1346_s3 = inlined_call_operand.vmem [shape: f32[1,4], index: 3, kind: input, shape index: {}]   ;;  %s1347_s4 = inlined_call_operand.vmem [shape: f32[1,4], index: 4, kind: input, shape index: {}]   ;;  %s1348_s7 = inlined_call_operand.<no memory space> [shape: f32[1,1], index: 7, kind: input, shape index: {}]   ;;  %s1349_s5 = inlined_call_operand.vmem [shape: f32[1,4], index: 5, kind: input, shape index: {}]   ;;  %s1350_s6 = inlined_call_operand.vmem [shape: f32[1,4], index: 6, kind: input, shape index: {}]   ;;  %s1351_s10 = inlined_call_operand.vmem [shape: f32[32,64], index: 10, kind: output, shape index: {}]  }
   0x1   :  { %v815_v0 = vld [vmem:[%s1341_s1 + $0x44] sm:$0xf]  ;;  %v71_v1 = vld [vmem:[%s1341_s1 + $0x20] sm:$0xf]  ;;  %v860_v2 = vld [vmem:[%s1341_s1 + $0x68] sm:$0xf] }
   0x2   :  { %v105_v3 = vunpack.c.l.b16 %v815_v0  ;;  %v162_v4 = vunpack.c.l.b16 %v71_v1  ;;  %v233_v5 = vunpack.c.l.b16 %v860_v2  ;;  %44 = vst.msk [vmem:[#allocation2 + $0x1] sm:$0xff] %vm43_vm0, %v989_v6  ;;  %v1065_v13 = vld [vmem:[%s1342_s0] sm:$0xff]  ;;  %v1070_v14 = vld [vmem:[%s1342_s0 + $0x8] sm:$0xff]  ;;  %vm38_vm3 = vcmask 581632   ;;  %v960_v16 = vld [vmem:[%s1341_s1 + $0x18] sm:$0xff] }
   0x3   :  { %45 = vst.msk [vmem:[#allocation2 + $0x9] sm:$0xff] %vm43_vm0, %v989_v6  ;;  %v964_v15 = vld [vmem:[%s1341_s1 + $0x3c] sm:$0xff]  ;;  %v1090_v18 = vld [vmem:[%s1342_s0 + $0x10] sm:$0xff]  ;;  %v958_v24 = vld [vmem:[%s1341_s1 + $0x8] sm:$0xff]  ;;  %vm115_vm4 = vcmask 588800   ;;  %vm305_vm5 = vcmask 1040384  }
   0x4   :  { %v110_v7 = vpack.c.b16 %v105_v3, %v105_v3  ;;  %v167_v8 = vpack.c.b16 %v162_v4, %v162_v4  ;;  %v238_v9 = vpack.c.b16 %v233_v5, %v233_v5  ;;  %46 = vst.msk [vmem:[#allocation2 + $0x19] sm:$0xff] %vm43_vm0, %v989_v6  ;;  %v968_v17 = vld [vmem:[%s1341_s1 + $0x60] sm:$0xff]  ;;  %v963_v19 = vld [vmem:[%s1341_s1 + $0x34] sm:$0xff]  ;;  %v962_v23 = vld [vmem:[%s1341_s1 + $0x2c] sm:$0xff]  ;;  %vm378_vm10 = vcmask 31744  }
   0x5   :  { %47 = vst.msk [vmem:[#allocation2 + $0x21] sm:$0xff] %vm43_vm0, %v989_v6  ;;  %v959_v20 = vld [vmem:[%s1341_s1 + $0x10] sm:$0xff]  ;;  %v1102_v21 = vld [vmem:[%s1342_s0 + $0x18] sm:$0xff]  ;;  %v961_v26 = vld [vmem:[%s1341_s1 + $0x24] sm:$0xff] }
   0x6   :  { %v124_v10 = vsel %vm122_vm1, %v110_v7, 0  ;;  %v179_v11 = vsel %vm122_vm1, %v167_v8, 0  ;;  %v250_v12 = vsel %vm122_vm1, %v238_v9, 0  ;;  %53 = vst.msk [vmem:[#allocation2 + $0x1] sm:$0xff] %vm52_vm2, %v1065_v13  ;;  %v967_v22 = vld [vmem:[%s1341_s1 + $0x58] sm:$0xff]  ;;  %v966_v25 = vld [vmem:[%s1341_s1 + $0x50] sm:$0xff] }
   0x7   :  { %129 = vmatpush.bf16.msra.mxu0 %v124_v10  ;;  %184 = vmatpush.bf16.msra.mxu1 %v179_v11  ;;  %54 = vst.msk [vmem:[#allocation2 + $0x9] sm:$0xff] %vm52_vm2, %v1070_v14  ;;  %v957_v27 = vld [vmem:[%s1341_s1] sm:$0xff]  ;;  %v965_v32 = vld [vmem:[%s1341_s1 + $0x48] sm:$0xff]  ;;  %v314_v49 = vld [vmem:[%s1343_s8 + $0x38] sm:$0xff] }
   0x8   :  { %255 = vmatpush.bf16.msra.mxu2 %v250_v12  ;;  %39 = vst.msk [vmem:[#allocation2] sm:$0x1] %vm38_vm3, %v989_v6  ;;  %326 = vmatpush.msra.mxu3 %v314_v49  ;;  %v313_v50 = vld [vmem:[%s1343_s8 + $0x30] sm:$0xff]  ;;  %v312_v54 = vld [vmem:[%s1343_s8 + $0x28] sm:$0xff]  ;;  %v311_v55 = vld [vmem:[%s1343_s8 + $0x20] sm:$0xff] }
   0x9   :  { %40 = vst.msk [vmem:[#allocation2 + $0x18] sm:$0x1] %vm38_vm3, %v989_v6  ;;  %v310_v56 = vld [vmem:[%s1343_s8 + $0x18] sm:$0xff]  ;;  %v309_v57 = vld [vmem:[%s1343_s8 + $0x10] sm:$0xff]  ;;  %v308_v58 = vld [vmem:[%s1343_s8 + $0x8] sm:$0xff] }
   0xa   :  { %41 = vst.msk [vmem:[#allocation2 + $0x11] sm:$0x1] %vm38_vm3, %v989_v6  ;;  %327 = vmatpush.msra.mxu3 %v313_v50  ;;  %v307_v60 = vld [vmem:[%s1343_s8] sm:$0xff] }
   0xb   :  { %130 = vmatpush.bf16.msra.mxu0 %v964_v15  ;;  %185 = vmatpush.bf16.msra.mxu1 %v960_v16  ;;  %42 = vst.msk [vmem:[#allocation2 + $0x29] sm:$0x1] %vm38_vm3, %v989_v6 }
   0xc   :  { %256 = vmatpush.bf16.msra.mxu2 %v968_v17  ;;  %55 = vst.msk [vmem:[#allocation2 + $0x19] sm:$0xff] %vm52_vm2, %v1090_v18  ;;  %328 = vmatpush.msra.mxu3 %v312_v54 }
   0xd   :  { %56 = vst.msk [vmem:[#allocation2 + $0x21] sm:$0xff] %vm52_vm2, %v1102_v21  ;;  %v72_v28 = vld [vmem:[#allocation2 + $0x1] sm:$0xff] }
   0xe   :  { %v73_v29 = vld [vmem:[#allocation2 + $0x9] sm:$0xff]  ;;  %329 = vmatpush.msra.mxu3 %v311_v55 }
   0xf   :  { %131 = vmatpush.bf16.msra.mxu0 %v963_v19  ;;  %186 = vmatpush.bf16.msra.mxu1 %v959_v20  ;;  %v57_v30 = vld [vmem:[#allocation2] sm:$0xff]  ;;  %v58_v31 = vld [vmem:[#allocation2 + $0x8] sm:$0xff]  ;;  %v76_v35 = vpack.c.bf16 %v73_v29, %v72_v28 }
  0x10   :  { %257 = vmatpush.bf16.msra.mxu2 %v967_v22  ;;  %v200_v33 = vld [vmem:[#allocation2 + $0x2] sm:$0xff]  ;;  %v61_v36 = vpack.c.bf16 %v58_v31, %v57_v30  ;;  %330 = vmatpush.msra.mxu3 %v310_v56 }
  0x11   :  { %v201_v34 = vld [vmem:[#allocation2 + $0xa] sm:$0xff] }
  0x12   :  { %v204_v37 = vpack.c.bf16 %v201_v34, %v200_v33  ;;  %331 = vmatpush.msra.mxu3 %v309_v57 }
  0x13   :  { %132 = vmatpush.bf16.msra.mxu0 %v962_v23  ;;  %187 = vmatpush.bf16.msra.mxu1 %v958_v24  ;;  %v74_v38 = vld [vmem:[#allocation2 + $0x19] sm:$0xff] }
  0x14   :  { %258 = vmatpush.bf16.msra.mxu2 %v966_v25  ;;  %v75_v39 = vld [vmem:[#allocation2 + $0x21] sm:$0xff]  ;;  %v59_v40 = vld [vmem:[#allocation2 + $0x18] sm:$0xff]  ;;  %332 = vmatpush.msra.mxu3 %v308_v58 }
  0x15   :  { %v60_v41 = vld [vmem:[#allocation2 + $0x20] sm:$0xff]  ;;  %v77_v44 = vpack.c.bf16 %v75_v39, %v74_v38 }
  0x16   :  { %v202_v42 = vld [vmem:[#allocation2 + $0x1a] sm:$0xff]  ;;  %v203_v43 = vld [vmem:[#allocation2 + $0x22] sm:$0xff]  ;;  %v62_v45 = vpack.c.bf16 %v60_v41, %v59_v40  ;;  %333 = vmatpush.msra.mxu3 %v307_v60 }
  0x17   :  { %133 = vmatpush.bf16.msra.mxu0 %v961_v26  ;;  %188 = vmatpush.bf16.msra.mxu1 %v957_v27  ;;  %v205_v46 = vpack.c.bf16 %v203_v43, %v202_v42 }
  0x18   :  { %259 = vmatpush.bf16.msra.mxu2 %v965_v32 }
  0x1a   :  { %832 = vmatmul.msk.bf16.vlgmr.msra.gmra.mxu0 %vm115_vm4, %v76_v35  ;;  %850 = vmatmul.msk.bf16.vlgmr.msra.gmra.mxu1 %vm115_vm4, %v61_v36 }
  0x1b   :  { %877 = vmatmul.msk.bf16.vlgmr.msra.gmra.mxu2 %vm115_vm4, %v204_v37 }
  0x1c   :  { %702 = vmatpush.msrb.mxu2 %v314_v49 }
  0x1e   :  { %703 = vmatpush.msrb.mxu2 %v313_v50 }
  0x20   :  { %704 = vmatpush.msrb.mxu2 %v312_v54 }
  0x22   :  { %705 = vmatpush.msrb.mxu2 %v311_v55 }
  0x24   :  { %706 = vmatpush.msrb.mxu2 %v310_v56 }
  0x26   :  { %707 = vmatpush.msrb.mxu2 %v309_v57 }
  0x28   :  { %708 = vmatpush.msrb.mxu2 %v308_v58 }
  0x2a   :  { %833 = vmatmul.msk.bf16.gmra.mxu0 %vm115_vm4, %v77_v44  ;;  %851 = vmatmul.msk.bf16.gmra.mxu1 %vm115_vm4, %v62_v45 }
  0x2b   :  { %878 = vmatmul.msk.bf16.gmra.mxu2 %vm115_vm4, %v205_v46  ;;  %v990_v46 = vmov 512.0  }
  0x2c   :  { %709 = vmatpush.msrb.mxu2 %v307_v60  ;;  %983 = vrcp.f32 %v990_v46  ;;  %v377_v60 = vld [vmem:[%s1344_s9] sm:$0xf] }
  0x2d   :  { %880 = vmatpush.msk.msrb.mxu3 %vm122_vm1, %v377_v60 }
  0x97   :  { %v135_v47 = vpop.f32.mrf.mxu0  ;;  %v190_v48 = vpop.f32.mrf.mxu1 }
  0x98   :  { %v191_v63 = vadd.f32 %v190_v48, %v135_v47  ;;  %v984_v47 = vpop.eup %983 }
  0x99   :  { %v339_v48 = vmul.f32 512.0, %v984_v47  ;;  %vm343_vm6 = vweird.f32 %v984_v47 }
  0x9b   :  { %v340_v49 = vsub.f32 1.0, %v339_v48 }
  0x9d   :  { %v341_v50 = vmul.f32 %v984_v47, %v340_v49 }
  0x9e   :  { %v261_v51 = vpop.f32.mrf.mxu2 }
  0x9f   :  { %v137_v52 = vpop.f32.mrf.mxu0  ;;  %v192_v53 = vpop.f32.mrf.mxu1  ;;  %v1162_v4 = vadd.f32 %v261_v51, %v191_v63  ;;  %v342_v51 = vadd.f32 %v984_v47, %v341_v50  ;;  %v935_v63 = vld [vmem:[%s1345_s2 + $0x68] sm:$0xf] }
  0xa0   :  { %v193_v0 = vadd.f32 %v192_v53, %v137_v52 }
  0xa1   :  { %v288_v9 = vmul.f32 %v1162_v4, %v1162_v4  ;;  %v275_v12 = vsel %vm52_vm2, %v1162_v4, 0.0  ;;  %v1190_v52 = vsel %vm343_vm6, %v984_v47, %v342_v51 }
  0xa3   :  { %v292_v22 = vsel %vm52_vm2, %v288_v9, 0.0 }
  0xa6   :  { %v263_v59 = vpop.f32.mrf.mxu2 }
  0xa7   :  { %v140_v61 = vpop.f32.mrf.mxu0  ;;  %v195_v62 = vpop.f32.mrf.mxu1  ;;  %v1160_v2 = vadd.f32 %v263_v59, %v193_v0 }
  0xa8   :  { %v196_v1 = vadd.f32 %v195_v62, %v140_v61  ;;  %v746_v61 = vld [vmem:[%s1344_s9] sm:$0xf] }
  0xa9   :  { %v289_v6 = vmul.f32 %v1160_v2, %v1160_v2  ;;  %v276_v10 = vsel %vm52_vm2, %v1160_v2, 0.0  ;;  %955 = vmatpush.msk.msra.mxu2 %vm122_vm1, %v746_v61  ;;  %v446_v62 = vld [vmem:[%s1345_s2 + $0x20] sm:$0xf] }
  0xaa   :  { %v277_v19 = vadd.f32 %v276_v10, %v275_v12  ;;  %v535_v0 = vunpack.c.l.b16 %v446_v62 }
  0xab   :  { %v293_v15 = vsel %vm52_vm2, %v289_v6, 0.0 }
  0xac   :  { %v294_v25 = vadd.f32 %v293_v15, %v292_v22  ;;  %v540_v6 = vpack.c.b16 %v535_v0, %v535_v0 }
  0xae   :  { %v266_v3 = vpop.f32.mrf.mxu2  ;;  %v552_v9 = vsel %vm122_vm1, %v540_v6, 0 }
  0xaf   :  { %v1164_v5 = vadd.f32 %v266_v3, %v196_v1  ;;  %v142_v7 = vpop.f32.mrf.mxu0  ;;  %v197_v8 = vpop.f32.mrf.mxu1  ;;  %v606_v1 = vunpack.c.l.b16 %v935_v63  ;;  %557 = vmatpush.bf16.msrb.mxu0 %v552_v9 }
  0xb0   :  { %v198_v17 = vadd.f32 %v197_v8, %v142_v7 }
  0xb1   :  { %v290_v11 = vmul.f32 %v1164_v5, %v1164_v5  ;;  %v278_v16 = vsel %vm52_vm2, %v1164_v5, 0.0  ;;  %v611_v7 = vpack.c.b16 %v606_v1, %v606_v1 }
  0xb2   :  { %v279_v26 = vadd.f32 %v278_v16, %v277_v19  ;;  %v363_v19 = vld [vmem:[%s1346_s3] sm:$0x1] }
  0xb3   :  { %v295_v23 = vsel %vm52_vm2, %v290_v11, 0.0  ;;  %v623_v10 = vsel %vm122_vm1, %v611_v7, 0 }
  0xb4   :  { %v296_v29 = vadd.f32 %v295_v23, %v294_v25  ;;  %628 = vmatpush.bf16.msrb.mxu1 %v623_v10  ;;  %v370_v23 = vld [vmem:[%s1347_s4] sm:$0x1] }
  0xb6   :  { %v268_v20 = vpop.f32.mrf.mxu2 }
  0xb7   :  { %v1181_v24 = vadd.f32 %v268_v20, %v198_v17 }
  0xb9   :  { %v280_v27 = vsel %vm52_vm2, %v1181_v24, 0.0  ;;  %v291_v28 = vmul.f32 %v1181_v24, %v1181_v24 }
  0xba   :  { %v281_v30 = vadd.f32 %v280_v27, %v279_v26 }
  0xbb   :  { %v297_v31 = vsel %vm52_vm2, %v291_v28, 0.0 }
  0xbc   :  { %v282_v32 = vrot.slane %v281_v30, 4  ;;  %v298_v33 = vadd.f32 %v297_v31, %v296_v29  ;;  %v890_v29 = vld [vmem:[%s1345_s2 + $0x44] sm:$0xf] }
  0xbe   :  { %v283_v34 = vadd.f32 %v282_v32, %v281_v30  ;;  %v299_v35 = vrot.slane %v298_v33, 4  ;;  %v480_v30 = vunpack.c.l.b16 %v890_v29 }
  0xc0   :  { %v284_v36 = vrot.slane %v283_v34, 2  ;;  %v300_v37 = vadd.f32 %v299_v35, %v298_v33  ;;  %v485_v31 = vpack.c.b16 %v480_v30, %v480_v30  ;;  %v972_v33 = vld [vmem:[%s1345_s2 + $0x18] sm:$0xff] }
  0xc1   :  { %v976_v35 = vld [vmem:[%s1345_s2 + $0x3c] sm:$0xff]  ;;  %558 = vmatpush.bf16.msrb.mxu0 %v972_v33 }
  0xc2   :  { %v285_v38 = vadd.f32 %v284_v36, %v283_v34  ;;  %v301_v39 = vrot.slane %v300_v37, 2  ;;  %v497_v32 = vsel %vm122_vm1, %v485_v31, 0  ;;  %v980_v34 = vld [vmem:[%s1345_s2 + $0x60] sm:$0xff]  ;;  %v971_v36 = vld [vmem:[%s1345_s2 + $0x10] sm:$0xff] }
  0xc3   :  { %629 = vmatpush.bf16.msrb.mxu1 %v980_v34 }
  0xc4   :  { %v286_v40 = vrot.slane %v285_v38, 1  ;;  %v302_v41 = vadd.f32 %v301_v39, %v300_v37  ;;  %v975_v37 = vld [vmem:[%s1345_s2 + $0x34] sm:$0xff]  ;;  %v974_v39 = vld [vmem:[%s1345_s2 + $0x2c] sm:$0xff] }
  0xc5   :  { %559 = vmatpush.bf16.msrb.mxu0 %v971_v36 }
  0xc6   :  { %v303_v42 = vrot.slane %v302_v41, 1  ;;  %v287_v43 = vadd.f32 %v286_v40, %v285_v38  ;;  %v979_v38 = vld [vmem:[%s1345_s2 + $0x58] sm:$0xff]  ;;  %v970_v40 = vld [vmem:[%s1345_s2 + $0x8] sm:$0xff] }
  0xc7   :  { %630 = vmatpush.bf16.msrb.mxu1 %v979_v38 }
  0xc8   :  { %v304_v44 = vadd.f32 %v303_v42, %v302_v41  ;;  %v978_v41 = vld [vmem:[%s1345_s2 + $0x50] sm:$0xff]  ;;  %v969_v42 = vld [vmem:[%s1345_s2] sm:$0xff] }
  0xc9   :  { %560 = vmatpush.bf16.msrb.mxu0 %v970_v40 }
  0xca   :  { %v306_v45 = vsel %vm305_vm5, %v287_v43, %v304_v44  ;;  %v977_v43 = vld [vmem:[%s1345_s2 + $0x48] sm:$0xff] }
  0xcb   :  { %879 = vmatmul.msk.f32.vlgmr.msra.gmra.mxu3 %vm52_vm2, %v306_v45  ;;  %631 = vmatpush.bf16.msrb.mxu1 %v978_v41  ;;  %v973_v44 = vld [vmem:[%s1345_s2 + $0x24] sm:$0xff] }
  0xcc   :  { %502 = vmatpush.bf16.msra.mxu3 %v497_v32 }
  0xcd   :  { %561 = vmatpush.bf16.msrb.mxu0 %v969_v42 }
  0xcf   :  { %632 = vmatpush.bf16.msrb.mxu1 %v977_v43 }
  0xd0   :  { %503 = vmatpush.bf16.msra.mxu3 %v976_v35 }
  0xd4   :  { %504 = vmatpush.bf16.msra.mxu3 %v975_v37 }
  0xd8   :  { %505 = vmatpush.bf16.msra.mxu3 %v974_v39 }
  0xdc   :  { %506 = vmatpush.bf16.msra.mxu3 %v973_v44 }
 0x14e   :  { %v335_v53 = vpop.f32.mrf.mxu3 }
 0x14f   :  { %v345_v54 = vmul.f32 %v1190_v52, %v335_v53  ;;  %v1264_v53 = vstv %s1348_s7 }
 0x151   :  { %v346_v55 = vmul.f32 %v345_v54, %v345_v54 }
 0x153   :  { %v348_v56 = vrot.slane %v346_v55, 7 }
 0x155   :  { %v350_v57 = vsub.f32 %v345_v54, %v348_v56 }
 0x157   :  { %v351_v58 = vmax.f32 %v350_v57, 0.0 }
 0x159   :  { %v352_v59 = vadd.f32 1e-05, %v351_v58 }
 0x15b   :  { %985 = vrsqrt.f32 %v352_v59  ;;  %vm359_vm8 = vweird.f32 %v352_v59 }
 0x161   :  { %v986_v3 = vpop.eup %985 }
 0x162   :  { %v354_v8 = vmul.f32 %v986_v3, %v352_v59  ;;  %vm360_vm7 = vweird.f32 %v986_v3 }
 0x163   :  { %vm361_vm9 = vmor %vm359_vm8, %vm360_vm7 }
 0x164   :  { %v355_v11 = vmul.f32 %v986_v3, %v354_v8 }
 0x166   :  { %v356_v12 = vmul.f32 0.5, %v355_v11 }
 0x168   :  { %v357_v15 = vsub.f32 1.5, %v356_v12 }
 0x16a   :  { %v358_v16 = vmul.f32 %v986_v3, %v357_v15 }
 0x16c   :  { %v362_v17 = vsel %vm361_vm9, %v986_v3, %v358_v16 }
 0x16d   :  { %365 = vst [vmem:[#allocation1] sm:$0xff] %v362_v17 }
 0x174   :  { %v367_v20 = vld [vmem:[#allocation1 + $0x1] ss:$9 sm:$0xff] }
 0x175   :  { %v369_v22 = vmul.f32 %v367_v20, %v363_v19 }
 0x177   :  { %v371_v25 = vmul.f32 %v369_v22, %v345_v54 }
 0x179   :  { %v372_v26 = vsub.f32 %v370_v23, %v371_v25 }
 0x17b   :  { %v374_v27 = vperm.slane %v372_v26, 0 }
 0x17d   :  { %v376_v28 = vsel %vm305_vm5, %v369_v22, %v374_v27 }
 0x17e   :  { %881 = vmatmul.msk.f32.vlgmr.msrb.gmra.mxu3 %vm378_vm10, %v376_v28 }
 0x201   :  { %v402_v45 = vpop.f32.mrf.mxu3 }
 0x202   :  { %v405_v46 = vperm.slane %v402_v45, 0  ;;  %v410_v47 = vperm.slane %v402_v45, 1 }
 0x204   :  { %v406_v48 = vmul.f32 %v405_v46, %v1162_v4  ;;  %v407_v49 = vmul.f32 %v405_v46, %v1160_v2  ;;  %v408_v50 = vmul.f32 %v405_v46, %v1164_v5  ;;  %v409_v51 = vmul.f32 %v405_v46, %v1181_v24 }
 0x206   :  { %v411_v54 = vadd.f32 %v410_v47, %v406_v48  ;;  %v412_v55 = vadd.f32 %v410_v47, %v407_v49  ;;  %v413_v56 = vadd.f32 %v410_v47, %v408_v50  ;;  %v414_v57 = vadd.f32 %v410_v47, %v409_v51 }
 0x208   :  { %vm415_vm11 = vcmp.gt.f32.partialorder %v411_v54, 0.0  ;;  %vm416_vm12 = vcmp.gt.f32.partialorder %v412_v55, 0.0  ;;  %vm417_vm13 = vcmp.gt.f32.partialorder %v413_v56, 0.0  ;;  %vm418_vm14 = vcmp.gt.f32.partialorder %v414_v57, 0.0 }
 0x209   :  { %v420_v4 = vmul.f32 %v1264_v53, %v411_v54  ;;  %v421_v2 = vmul.f32 %v1264_v53, %v412_v55  ;;  %v422_v5 = vmul.f32 %v1264_v53, %v413_v56  ;;  %v423_v24 = vmul.f32 %v1264_v53, %v414_v57 }
 0x20b   :  { %v424_v58 = vsel %vm415_vm11, %v411_v54, %v420_v4  ;;  %v425_v59 = vsel %vm416_vm12, %v412_v55, %v421_v2  ;;  %v426_v60 = vsel %vm417_vm13, %v413_v56, %v422_v5  ;;  %v427_v61 = vsel %vm418_vm14, %v414_v57, %v423_v24 }
 0x20c   :  { %428 = vst.msk [vmem:[#allocation2 + $0x1] sm:$0xff] %vm52_vm2, %v424_v58 }
 0x20d   :  { %429 = vst.msk [vmem:[#allocation2 + $0x9] sm:$0xff] %vm52_vm2, %v425_v59 }
 0x20e   :  { %430 = vst.msk [vmem:[#allocation2 + $0x19] sm:$0xff] %vm52_vm2, %v426_v60 }
 0x20f   :  { %431 = vst.msk [vmem:[#allocation2 + $0x21] sm:$0xff] %vm52_vm2, %v427_v61 }
 0x213   :  { %v447_v62 = vld [vmem:[#allocation2 + $0x1] sm:$0xff] }
 0x214   :  { %v432_v63 = vld [vmem:[#allocation2] sm:$0xff]  ;;  %v448_v0 = vld [vmem:[#allocation2 + $0x9] sm:$0xff] }
 0x215   :  { %v433_v1 = vld [vmem:[#allocation2 + $0x8] sm:$0xff]  ;;  %v451_v6 = vpack.c.bf16 %v448_v0, %v447_v62  ;;  %v449_v10 = vld [vmem:[#allocation2 + $0x19] sm:$0xff] }
 0x216   :  { %v573_v3 = vld [vmem:[#allocation2 + $0x2] sm:$0xff]  ;;  %v436_v7 = vpack.c.bf16 %v433_v1, %v432_v63  ;;  %v574_v8 = vld [vmem:[#allocation2 + $0xa] sm:$0xff]  ;;  %v434_v12 = vld [vmem:[#allocation2 + $0x18] sm:$0xff] }
 0x217   :  { %v577_v9 = vpack.c.bf16 %v574_v8, %v573_v3  ;;  %907 = vmatmul.msk.bf16.vlgmr.msra.gmra.mxu3 %vm115_vm4, %v451_v6  ;;  %v450_v11 = vld [vmem:[#allocation2 + $0x21] sm:$0xff] }
 0x218   :  { %925 = vmatmul.msk.bf16.vlgmr.msrb.gmra.mxu0 %vm115_vm4, %v436_v7  ;;  %v435_v15 = vld [vmem:[#allocation2 + $0x20] sm:$0xff]  ;;  %v452_v19 = vpack.c.bf16 %v450_v11, %v449_v10 }
 0x219   :  { %952 = vmatmul.msk.bf16.vlgmr.msrb.gmra.mxu1 %vm115_vm4, %v577_v9  ;;  %v575_v16 = vld [vmem:[#allocation2 + $0x1a] sm:$0xff]  ;;  %v576_v17 = vld [vmem:[#allocation2 + $0x22] sm:$0xff]  ;;  %v437_v20 = vpack.c.bf16 %v435_v15, %v434_v12 }
 0x21a   :  { %v578_v22 = vpack.c.bf16 %v576_v17, %v575_v16 }
 0x227   :  { %908 = vmatmul.msk.bf16.gmra.mxu3 %vm115_vm4, %v452_v19 }
 0x228   :  { %926 = vmatmul.msk.bf16.gmra.mxu0 %vm115_vm4, %v437_v20 }
 0x229   :  { %953 = vmatmul.msk.bf16.gmra.mxu1 %vm115_vm4, %v578_v22 }
 0x295   :  { %v563_v23 = vpop.f32.mrf.mxu0 }
 0x296   :  { %v634_v25 = vpop.f32.mrf.mxu1 }
 0x29a   :  { %v508_v26 = vpop.f32.mrf.mxu3 }
 0x29b   :  { %v564_v32 = vadd.f32 %v563_v23, %v508_v26 }
 0x29d   :  { %v565_v27 = vpop.f32.mrf.mxu0  ;;  %v1282_v37 = vadd.f32 %v634_v25, %v564_v32 }
 0x29e   :  { %v636_v28 = vpop.f32.mrf.mxu1 }
 0x29f   :  { %v665_v40 = vmul.f32 %v1282_v37, %v1282_v37  ;;  %v652_v45 = vsel %vm52_vm2, %v1282_v37, 0.0 }
 0x2a1   :  { %v669_v51 = vsel %vm52_vm2, %v665_v40, 0.0 }
 0x2a2   :  { %v510_v29 = vpop.f32.mrf.mxu3 }
 0x2a3   :  { %v566_v30 = vadd.f32 %v565_v27, %v510_v29 }
 0x2a5   :  { %v568_v31 = vpop.f32.mrf.mxu0  ;;  %v1280_v35 = vadd.f32 %v636_v28, %v566_v30 }
 0x2a6   :  { %v639_v33 = vpop.f32.mrf.mxu1 }
 0x2a7   :  { %v666_v39 = vmul.f32 %v1280_v35, %v1280_v35  ;;  %v653_v41 = vsel %vm52_vm2, %v1280_v35, 0.0 }
 0x2a8   :  { %v654_v49 = vadd.f32 %v653_v41, %v652_v45 }
 0x2a9   :  { %v670_v46 = vsel %vm52_vm2, %v666_v39, 0.0 }
 0x2aa   :  { %v513_v34 = vpop.f32.mrf.mxu3  ;;  %v671_v56 = vadd.f32 %v670_v46, %v669_v51 }
 0x2ab   :  { %v569_v36 = vadd.f32 %v568_v31, %v513_v34 }
 0x2ad   :  { %v1284_v38 = vadd.f32 %v639_v33, %v569_v36  ;;  %v570_v43 = vpop.f32.mrf.mxu0  ;;  %v739_v33 = vld [vmem:[%s1350_s6] sm:$0x1] }
 0x2ae   :  { %v641_v50 = vpop.f32.mrf.mxu1 }
 0x2af   :  { %v667_v42 = vmul.f32 %v1284_v38, %v1284_v38  ;;  %v655_v47 = vsel %vm52_vm2, %v1284_v38, 0.0 }
 0x2b0   :  { %v656_v57 = vadd.f32 %v655_v47, %v654_v49 }
 0x2b1   :  { %v672_v54 = vsel %vm52_vm2, %v667_v42, 0.0 }
 0x2b2   :  { %v515_v44 = vpop.f32.mrf.mxu3  ;;  %v673_v5 = vadd.f32 %v672_v54, %v671_v56 }
 0x2b3   :  { %v571_v48 = vadd.f32 %v570_v43, %v515_v44 }
 0x2b5   :  { %v647_v55 = vadd.f32 %v641_v50, %v571_v48 }
 0x2b7   :  { %v657_v4 = vsel %vm52_vm2, %v647_v55, 0.0  ;;  %v668_v2 = vmul.f32 %v647_v55, %v647_v55 }
 0x2b8   :  { %v658_v24 = vadd.f32 %v657_v4, %v656_v57 }
 0x2b9   :  { %v674_v58 = vsel %vm52_vm2, %v668_v2, 0.0 }
 0x2ba   :  { %v659_v59 = vrot.slane %v658_v24, 4  ;;  %v675_v60 = vadd.f32 %v674_v58, %v673_v5 }
 0x2bc   :  { %v660_v61 = vadd.f32 %v659_v59, %v658_v24  ;;  %v676_v62 = vrot.slane %v675_v60, 4 }
 0x2be   :  { %v661_v63 = vrot.slane %v660_v61, 2  ;;  %v677_v0 = vadd.f32 %v676_v62, %v675_v60 }
 0x2c0   :  { %v662_v1 = vadd.f32 %v661_v63, %v660_v61  ;;  %v678_v3 = vrot.slane %v677_v0, 2 }
 0x2c2   :  { %v663_v6 = vrot.slane %v662_v1, 1  ;;  %v679_v7 = vadd.f32 %v678_v3, %v677_v0 }
 0x2c4   :  { %v680_v8 = vrot.slane %v679_v7, 1  ;;  %v664_v9 = vadd.f32 %v663_v6, %v662_v1 }
 0x2c6   :  { %v681_v10 = vadd.f32 %v680_v8, %v679_v7 }
 0x2c8   :  { %v682_v11 = vsel %vm305_vm5, %v664_v9, %v681_v10 }
 0x2c9   :  { %954 = vmatmul.msk.f32.vlgmr.msrb.gmra.mxu2 %vm52_vm2, %v682_v11 }
 0x34c   :  { %v711_v12 = vpop.f32.mrf.mxu2 }
 0x34d   :  { %v714_v15 = vmul.f32 %v711_v12, %v1190_v52  ;;  %v732_v52 = vld [vmem:[%s1349_s5] sm:$0x1] }
 0x34f   :  { %v715_v16 = vmul.f32 %v714_v15, %v714_v15 }
 0x351   :  { %v717_v17 = vrot.slane %v715_v16, 7 }
 0x353   :  { %v719_v19 = vsub.f32 %v714_v15, %v717_v17 }
 0x355   :  { %v720_v20 = vmax.f32 %v719_v19, 0.0 }
 0x357   :  { %v721_v22 = vadd.f32 1e-05, %v720_v20 }
 0x359   :  { %987 = vrsqrt.f32 %v721_v22  ;;  %vm728_vm0 = vweird.f32 %v721_v22 }
 0x35f   :  { %v988_v23 = vpop.eup %987 }
 0x360   :  { %v723_v25 = vmul.f32 %v988_v23, %v721_v22  ;;  %vm729_vm15 = vweird.f32 %v988_v23 }
 0x361   :  { %vm730_vm1 = vmor %vm728_vm0, %vm729_vm15 }
 0x362   :  { %v724_v26 = vmul.f32 %v988_v23, %v723_v25 }
 0x364   :  { %v725_v27 = vmul.f32 0.5, %v724_v26 }
 0x366   :  { %v726_v28 = vsub.f32 1.5, %v725_v27 }
 0x368   :  { %v727_v29 = vmul.f32 %v988_v23, %v726_v28 }
 0x36a   :  { %v731_v30 = vsel %vm730_vm1, %v988_v23, %v727_v29 }
 0x36b   :  { %734 = vst [vmem:[#allocation1] sm:$0xff] %v731_v30 }
 0x372   :  { %v736_v31 = vld [vmem:[#allocation1 + $0x1] ss:$9 sm:$0xff] }
 0x373   :  { %v738_v32 = vmul.f32 %v736_v31, %v732_v52 }
 0x375   :  { %v740_v34 = vmul.f32 %v738_v32, %v714_v15 }
 0x377   :  { %v741_v36 = vsub.f32 %v739_v33, %v740_v34 }
 0x379   :  { %v743_v39 = vperm.slane %v741_v36, 0 }
 0x37b   :  { %v745_v40 = vsel %vm305_vm5, %v738_v32, %v743_v39 }
 0x37c   :  { %956 = vmatmul.msk.f32.vlgmr.msra.gmra.mxu2 %vm378_vm10, %v745_v40 }
 0x3ff   :  { %v770_v41 = vpop.f32.mrf.mxu2 }
 0x400   :  { %v773_v42 = vperm.slane %v770_v41, 0  ;;  %v778_v43 = vperm.slane %v770_v41, 1 }
 0x402   :  { %v774_v44 = vmul.f32 %v773_v42, %v1282_v37  ;;  %v775_v45 = vmul.f32 %v773_v42, %v1280_v35  ;;  %v776_v46 = vmul.f32 %v773_v42, %v1284_v38  ;;  %v777_v47 = vmul.f32 %v773_v42, %v647_v55 }
 0x404   :  { %v779_v48 = vadd.f32 %v778_v43, %v774_v44  ;;  %v780_v49 = vadd.f32 %v778_v43, %v775_v45  ;;  %v781_v50 = vadd.f32 %v778_v43, %v776_v46  ;;  %v782_v51 = vadd.f32 %v778_v43, %v777_v47 }
 0x406   :  { %v783_v54 = vadd.f32 %v779_v48, %v1065_v13  ;;  %v784_v56 = vadd.f32 %v780_v49, %v1070_v14  ;;  %v785_v57 = vadd.f32 %v781_v50, %v1090_v18  ;;  %v786_v4 = vadd.f32 %v782_v51, %v1102_v21 }
 0x408   :  { %vm787_vm3 = vcmp.gt.f32.partialorder %v783_v54, 0.0  ;;  %vm788_vm4 = vcmp.gt.f32.partialorder %v784_v56, 0.0  ;;  %vm789_vm5 = vcmp.gt.f32.partialorder %v785_v57, 0.0  ;;  %vm790_vm6 = vcmp.gt.f32.partialorder %v786_v4, 0.0 }
 0x409   :  { %v791_v35 = vmul.f32 %v783_v54, %v1264_v53  ;;  %v792_v37 = vmul.f32 %v784_v56, %v1264_v53  ;;  %v793_v38 = vmul.f32 %v785_v57, %v1264_v53  ;;  %v794_v55 = vmul.f32 %v786_v4, %v1264_v53 }
 0x40b   :  { %v795_v2 = vsel %vm787_vm3, %v783_v54, %v791_v35  ;;  %v796_v13 = vsel %vm788_vm4, %v784_v56, %v792_v37  ;;  %v797_v5 = vsel %vm789_vm5, %v785_v57, %v793_v38  ;;  %v798_v14 = vsel %vm790_vm6, %v786_v4, %v794_v55 }
 0x40c   :  { %799 = vst.msk [vmem:[%s1351_s10] sm:$0xff] %vm52_vm2, %v795_v2 }
 0x40d   :  { %800 = vst.msk [vmem:[%s1351_s10 + $0x8] sm:$0xff] %vm52_vm2, %v796_v13 }
 0x40e   :  { %801 = vst.msk [vmem:[%s1351_s10 + $0x10] sm:$0xff] %vm52_vm2, %v797_v5 }
 0x40f   :  { %802 = vst.msk [vmem:[%s1351_s10 + $0x18] sm:$0xff] %vm52_vm2, %v798_v14 }

</bundles_post_ra>
